<compile_context>
chip_gen: v5e
topology: v5e:2x2
jax: 0.10.0
libtpu: 0.0.40
codegen_flags: <defaults>
</compile_context>

<pallas_src>
import jax
import jax.numpy as jnp
from jax.experimental import pallas as pl
from jax.experimental.pallas import tpu as pltpu

IN_F = 400
HID_F = 400
OUT_F = 63

# lane-dense padded dims (weight output dims only; x / K stays at 400)
HID_P = 512
OUT_P = 128

TM_MAX = 512  # max batch tile; ~2.5 MiB total VMEM incl. double buffering


def _round_up(x, m):
    return (x + m - 1) // m * m


def _choose_tiling(B):
    """Pick (tm, b_pad) for the batch grid.

    - multiples of 16 for clean bf16 sublane packing
    - B <= 128: single tile (grid overhead not worth splitting tiny work)
    - B  > 128: >= 2 balanced tiles (v7x megacore sharding), <= TM_MAX each,
                sized to minimize tail padding.
    """
    if B <= 128:
        tm = _round_up(B, 16)
        return tm, tm
    n_tiles = max(2, pl.cdiv(B, TM_MAX))
    tm = _round_up(pl.cdiv(B, n_tiles), 16)
    return tm, n_tiles * tm


def _mlp_kernel(x_ref, w1_ref, b1_ref, w2_ref, b2_ref, o_ref):
    # fc1: (tm, 400) bf16 x (400, 512) bf16 -> f32 accumulate on MXU
    h = jnp.dot(x_ref[...], w1_ref[...], preferred_element_type=jnp.float32)
    h = jnp.maximum(h + b1_ref[...], 0.0)
    # drop1: identity in eval mode
    # fc2: (tm, 512) bf16 x (512, 128) bf16 -> f32 accumulate
    y = jnp.dot(h.astype(jnp.bfloat16), w2_ref[...],
                preferred_element_type=jnp.float32)
    o_ref[...] = (y + b2_ref[...]).astype(o_ref.dtype)


def prepare_params(w1, b1, w2, b2):
    """One-time padding + bf16 cast of the weights (hoisted out of forward).

    w1: (400, 400) f32 stored as (in, out)  (torch W1.T)
    b1: (400,)     f32
    w2: (400, 63)  f32 stored as (in, out)  (torch W2.T)
    b2: (63,)      f32
    """
    w1p = jnp.zeros((IN_F, HID_P), jnp.float32).at[:, :HID_F].set(w1)
    w1p = w1p.astype(jnp.bfloat16)                       # (400, 512) bf16
    b1p = jnp.zeros((1, HID_P), jnp.float32).at[0, :HID_F].set(b1)

    w2p = jnp.zeros((HID_P, OUT_P), jnp.float32).at[:HID_F, :OUT_F].set(w2)
    w2p = w2p.astype(jnp.bfloat16)                       # (512, 128) bf16
    b2p = jnp.zeros((1, OUT_P), jnp.float32).at[0, :OUT_F].set(b2)
    return w1p, b1p, w2p, b2p


def out_network_forward(x, w1p, b1p, w2p, b2p):
    """Forward pass of OutNetwork (eval mode).

    x: (B, 400) f32.  w1p/b1p/w2p/b2p: outputs of prepare_params().
    returns (B, 63) f32.
    """
    B = x.shape[0]
    tm, b_pad = _choose_tiling(B)
    grid = (b_pad // tm,)

    # cast to bf16 first, then (only if needed) pad the batch dim
    xb = x.astype(jnp.bfloat16)
    if b_pad != B:
        xb = jnp.zeros((b_pad, IN_F), jnp.bfloat16).at[:B, :].set(xb)

    out = pl.pallas_call(
        _mlp_kernel,
        out_shape=jax.ShapeDtypeStruct((b_pad, OUT_P), jnp.float32),
        grid=grid,
        in_specs=[
            # x: one batch tile per grid step; last dim 400 == full array dim
            pl.BlockSpec((tm, IN_F), lambda i: (i, 0)),
            # weights / biases: constant index_map -> resident across steps
            pl.BlockSpec((IN_F, HID_P), lambda i: (0, 0)),
            pl.BlockSpec((1, HID_P), lambda i: (0, 0)),
            pl.BlockSpec((HID_P, OUT_P), lambda i: (0, 0)),
            pl.BlockSpec((1, OUT_P), lambda i: (0, 0)),
        ],
        out_specs=pl.BlockSpec((tm, OUT_P), lambda i: (i, 0)),
        compiler_params=pltpu.CompilerParams(
            dimension_semantics=("parallel",)),
    )(xb, w1p, b1p, w2p, b2p)

    # slice away batch and output-feature padding
    return out[:B, :OUT_F]


def init_params(key):
    """Deterministic init mimicking torch.nn.Linear default:
    U(-1/sqrt(fan_in), 1/sqrt(fan_in)) for both weight and bias."""
    k1, k2, k3, k4 = jax.random.split(key, 4)
    bound1 = 1.0 / jnp.sqrt(jnp.float32(IN_F))
    bound2 = 1.0 / jnp.sqrt(jnp.float32(HID_F))
    # stored as (in, out) = torch weight transposed
    w1 = jax.random.uniform(k1, (IN_F, HID_F), jnp.float32, -bound1, bound1)
    b1 = jax.random.uniform(k2, (HID_F,), jnp.float32, -bound1, bound1)
    w2 = jax.random.uniform(k3, (HID_F, OUT_F), jnp.float32, -bound2, bound2)
    b2 = jax.random.uniform(k4, (OUT_F,), jnp.float32, -bound2, bound2)
    return w1, b1, w2, b2


def _reference(x, w1, b1, w2, b2):
    """Same bf16-operand / f32-accumulate math as the kernel."""
    xb = x.astype(jnp.bfloat16)
    w1b = w1.astype(jnp.bfloat16)
    w2b = w2.astype(jnp.bfloat16)
    h = jnp.maximum(
        jnp.dot(xb, w1b, preferred_element_type=jnp.float32) + b1[None, :], 0.0)
    return jnp.dot(h.astype(jnp.bfloat16), w2b,
                   preferred_element_type=jnp.float32) + b2[None, :]


if __name__ == "__main__":
    key = jax.random.PRNGKey(0)
    pkey, xkey1, xkey2 = jax.random.split(key, 3)
    w1, b1, w2, b2 = init_params(pkey)

    # one-time weight prep (hoisted out of the forward path)
    params = jax.tree_util.tree_map(jax.block_until_ready,
                                    prepare_params(w1, b1, w2, b2))
    fwd = jax.jit(out_network_forward)

    # --- small batch: single-tile path ---
    B1 = 8
    x1 = jax.random.normal(xkey1, (B1, IN_F), jnp.float32)
    out1 = jax.block_until_ready(fwd(x1, *params))
    assert out1.shape == (B1, OUT_F)
    ref1 = _reference(x1, w1, b1, w2, b2)
    assert jnp.allclose(out1, ref1, atol=1e-2, rtol=1e-2)

    # --- medium batch: 2-tile grid (exercises balanced tiling + padding) ---
    B2 = 200
    x2 = jax.random.normal(xkey2, (B2, IN_F), jnp.float32)
    out2 = jax.block_until_ready(fwd(x2, *params))
    assert out2.shape == (B2, OUT_F)
    ref2 = _reference(x2, w1, b1, w2, b2)
    assert jnp.allclose(out2, ref2, atol=1e-2, rtol=1e-2)

    # sanity vs full-f32 math (looser tolerance due to bf16 operands)
    ref_f32 = jnp.maximum(x1 @ w1 + b1[None, :], 0.0) @ w2 + b2[None, :]
    assert jnp.allclose(out1, ref_f32, atol=5e-2, rtol=5e-2)

    print("KERNEL_OK")
</pallas_src>

<mosaic_0001>
module attributes {stable_mosaic.version = 11 : i64} {
  func.func @_mlp_kernel(%arg0: i32, %arg1: memref<16x400xbf16, #tpu.memory_space<vmem>>, %arg2: memref<400x512xbf16, #tpu.memory_space<vmem>>, %arg3: memref<1x512xf32, #tpu.memory_space<vmem>>, %arg4: memref<512x128xbf16, #tpu.memory_space<vmem>>, %arg5: memref<1x128xf32, #tpu.memory_space<vmem>>, %arg6: memref<16x128xf32, #tpu.memory_space<vmem>>) attributes {dimension_semantics = [#tpu.dimension_semantics<parallel>], iteration_bounds = array<i64: 1>, scalar_prefetch = 0 : i64, scratch_operands = 0 : i64, tpu.core_type = #tpu.core_type<tc>, window_params = [{transform_indices = @transform_0, window_bounds = array<i64: 16, 400>}, {pipeline_mode = #tpu.pipeline_mode<synchronous>, transform_indices = @transform_1, window_bounds = array<i64: 400, 512>}, {pipeline_mode = #tpu.pipeline_mode<synchronous>, transform_indices = @transform_2, window_bounds = array<i64: 1, 512>}, {pipeline_mode = #tpu.pipeline_mode<synchronous>, transform_indices = @transform_3, window_bounds = array<i64: 512, 128>}, {pipeline_mode = #tpu.pipeline_mode<synchronous>, transform_indices = @transform_4, window_bounds = array<i64: 1, 128>}, {transform_indices = @transform_5, window_bounds = array<i64: 16, 128>}]} {
    %c0 = arith.constant 0 : index
    %c0_0 = arith.constant 0 : index
    %0 = vector.load %arg1[%c0, %c0_0] : memref<16x400xbf16, #tpu.memory_space<vmem>>, vector<16x400xbf16>
    %c0_1 = arith.constant 0 : index
    %c0_2 = arith.constant 0 : index
    %1 = vector.load %arg2[%c0_1, %c0_2] : memref<400x512xbf16, #tpu.memory_space<vmem>>, vector<400x512xbf16>
    %cst = arith.constant dense<0.000000e+00> : vector<16x512xf32>
    %2 = tpu.matmul %0, %1, %cst {dimension_numbers = #tpu.dot_dimension_numbers<[1], [0], [0], [1], [0, 0, 1, 1], [], []>} : vector<16x400xbf16>, vector<400x512xbf16>, vector<16x512xf32> -> vector<16x512xf32>
    %c0_3 = arith.constant 0 : index
    %c0_4 = arith.constant 0 : index
    %3 = vector.load %arg3[%c0_3, %c0_4] : memref<1x512xf32, #tpu.memory_space<vmem>>, vector<1x512xf32>
    %4 = vector.broadcast %3 : vector<1x512xf32> to vector<16x512xf32>
    %5 = arith.addf %2, %4 : vector<16x512xf32>
    %cst_5 = arith.constant 0.000000e+00 : f32
    %6 = vector.broadcast %cst_5 : f32 to vector<16x512xf32>
    %7 = arith.maximumf %5, %6 : vector<16x512xf32>
    %8 = arith.truncf %7 : vector<16x512xf32> to vector<16x512xbf16>
    %c0_6 = arith.constant 0 : index
    %c0_7 = arith.constant 0 : index
    %9 = vector.load %arg4[%c0_6, %c0_7] : memref<512x128xbf16, #tpu.memory_space<vmem>>, vector<512x128xbf16>
    %cst_8 = arith.constant dense<0.000000e+00> : vector<16x128xf32>
    %10 = tpu.matmul %8, %9, %cst_8 {dimension_numbers = #tpu.dot_dimension_numbers<[1], [0], [0], [1], [0, 0, 1, 1], [], []>} : vector<16x512xbf16>, vector<512x128xbf16>, vector<16x128xf32> -> vector<16x128xf32>
    %c0_9 = arith.constant 0 : index
    %c0_10 = arith.constant 0 : index
    %11 = vector.load %arg5[%c0_9, %c0_10] : memref<1x128xf32, #tpu.memory_space<vmem>>, vector<1x128xf32>
    %12 = vector.broadcast %11 : vector<1x128xf32> to vector<16x128xf32>
    %13 = arith.addf %10, %12 : vector<16x128xf32>
    %c0_11 = arith.constant 0 : index
    %c0_12 = arith.constant 0 : index
    %14 = vector.load %arg6[%c0_11, %c0_12] : memref<16x128xf32, #tpu.memory_space<vmem>>, vector<16x128xf32>
    tpu.vector_store %arg6[%c0_11, %c0_12], %13 {strides = array<i32>} : memref<16x128xf32, #tpu.memory_space<vmem>>, vector<16x128xf32>,
    return
  }
  func.func @transform_0(%arg0: i32) -> (i32, i32) {
    %c0_i32 = arith.constant 0 : i32
    %c0_i32_0 = arith.constant 0 : i32
    return %arg0, %c0_i32 : i32, i32
  }
  func.func @transform_1(%arg0: i32) -> (i32, i32) {
    %c0_i32 = arith.constant 0 : i32
    %c0_i32_0 = arith.constant 0 : i32
    %c0_i32_1 = arith.constant 0 : i32
    return %c0_i32, %c0_i32_0 : i32, i32
  }
  func.func @transform_2(%arg0: i32) -> (i32, i32) {
    %c0_i32 = arith.constant 0 : i32
    %c0_i32_0 = arith.constant 0 : i32
    %c0_i32_1 = arith.constant 0 : i32
    return %c0_i32, %c0_i32_0 : i32, i32
  }
  func.func @transform_3(%arg0: i32) -> (i32, i32) {
    %c0_i32 = arith.constant 0 : i32
    %c0_i32_0 = arith.constant 0 : i32
    %c0_i32_1 = arith.constant 0 : i32
    return %c0_i32, %c0_i32_0 : i32, i32
  }
  func.func @transform_4(%arg0: i32) -> (i32, i32) {
    %c0_i32 = arith.constant 0 : i32
    %c0_i32_0 = arith.constant 0 : i32
    %c0_i32_1 = arith.constant 0 : i32
    return %c0_i32, %c0_i32_0 : i32, i32
  }
  func.func @transform_5(%arg0: i32) -> (i32, i32) {
    %c0_i32 = arith.constant 0 : i32
    %c0_i32_0 = arith.constant 0 : i32
    return %arg0, %c0_i32 : i32, i32
  }
}

</mosaic_0001>

<bundles_post_ra>
// kernel: out_network_forward.1
= control target key start
LH: loop header
LB: loop body
LE: loop exit
PB: predicated region body
PF: predicated region fallthrough
CT: control target
= control target key end

     0   :  { %10 = vsyncpa [#allocation3], 0  ;;  %s2105_s0 = inlined_call_operand.vmem [shape: bf16[16,400], index: 0, kind: input, shape index: {}]   ;;  %s2106_s1 = inlined_call_operand.hbm [shape: bf16[400,512], index: 1, kind: input, shape index: {}]   ;;  %s2107_s2 = inlined_call_operand.vmem [shape: f32[1,512], index: 2, kind: input, shape index: {}]   ;;  %s2108_s3 = inlined_call_operand.hbm [shape: bf16[512,128], index: 3, kind: input, shape index: {}]   ;;  %s2109_s4 = inlined_call_operand.vmem [shape: f32[1,128], index: 4, kind: input, shape index: {}]   ;;  %s2110_s5 = inlined_call_operand.vmem [shape: f32[16,128], index: 5, kind: output, shape index: {}]  }
   0x1   :  { %s18_s20 = sshll.u32 %s2106_s1, 4  ;;  %s19_s20 = int_to_ptr.hbm [resolvable:$true] %s18_s20 }
   0x2   :  { %11 = vsyncpa [#allocation5], 0  ;;  %s1993_s21 = smov [#allocation2]   ;;  %s33_s25 = sshll.u32 %s2108_s3, 4  ;;  %s34_s25 = int_to_ptr.hbm [resolvable:$true] %s33_s25 }
   0x3   :  { %s20_s22 = sshll.u32 %s1993_s21, 4  ;;  %s1994_s26 = smov 256   ;;  %s21_s22 = int_to_ptr.vmem [resolvable:$true] %s20_s22 }
   0x4   :  { %s1995_s27 = smov 16   ;;  %s1996_s28 = smov [#allocation4]  }
   0x5   :  { %26 = dma.hbm_to_vmem [thread:$0]  %s19_s20, 12800, %s21_s22, [#allocation3], %s1994_s26, %s1994_s26, %s1995_s27  }
   0x6   :  { %s35_s29 = sshll.u32 %s1996_s28, 4  ;;  %s1997_s30 = smov 64   ;;  %s36_s29 = int_to_ptr.vmem [resolvable:$true] %s35_s29 }
   0x7   :  { %s1998_s6 = smov 4  }
   0x8   :  { %41 = dma.hbm_to_vmem [thread:$0]  %s34_s25, 4096, %s36_s29, [#allocation5], %s1997_s30, %s1997_s30, %s1998_s6  }
   0x9   :  { %1989 = dma.done.wait [#allocation3], 12800  }
   0xa   :  { %1990 = vsyncadd [#allocation3], 4294954496 }
   0xb   :  { %1991 = dma.done.wait [#allocation5], 4096  }
   0xc   :  { %1992 = vsyncadd [#allocation5], 4294963200  ;;  %v1380_v0 = vld [vmem:[#allocation2 + $0xe0] sm:$0xf]  ;;  %v1832_v1 = vld [vmem:[#allocation2 + $0xec] sm:$0xf0] }
   0xd   :  { %v1636_v2 = vld [vmem:[#allocation2 + $0x2e0] sm:$0xf]  ;;  %v1381_v3 = vor.u32 %v1832_v1, %v1380_v0  ;;  %v1896_v4 = vld [vmem:[#allocation2 + $0x2ec] sm:$0xf0]  ;;  %v1830_v11 = vld [vmem:[#allocation2 + $0xe4] sm:$0xf] }
   0xe   :  { %v1652_v5 = vld [vmem:[#allocation2 + $0x300] sm:$0xf]  ;;  %v1900_v6 = vld [vmem:[#allocation2 + $0x30c] sm:$0xf0]  ;;  %v1637_v7 = vor.u32 %v1896_v4, %v1636_v2  ;;  %v1382_v13 = vld [vmem:[#allocation2 + $0xf0] sm:$0xf0] }
   0xf   :  { %v1653_v8 = vor.u32 %v1900_v6, %v1652_v5  ;;  %v1508_v9 = vld [vmem:[#allocation2 + $0x1e0] sm:$0xf]  ;;  %v1864_v10 = vld [vmem:[#allocation2 + $0x1ec] sm:$0xf0]  ;;  %690 = vmatpush.bf16.msra.mxu0 %v1381_v3  ;;  %v1385_v16 = vor.u32 %v1830_v11, %v1382_v13  ;;  %v1826_v23 = vld [vmem:[#allocation2 + $0xc4] sm:$0xf] }
  0x10   :  { %v1509_v12 = vor.u32 %v1864_v10, %v1508_v9  ;;  %v1364_v14 = vld [vmem:[#allocation2 + $0xc0] sm:$0xf]  ;;  %v1828_v15 = vld [vmem:[#allocation2 + $0xcc] sm:$0xf0]  ;;  %718 = vmatpush.bf16.msra.mxu2 %v1637_v7  ;;  %v1366_v24 = vld [vmem:[#allocation2 + $0xd0] sm:$0xf0] }
  0x11   :  { %739 = vmatpush.bf16.msra.mxu3 %v1653_v8  ;;  %v1365_v17 = vor.u32 %v1828_v15, %v1364_v14  ;;  %v1620_v18 = vld [vmem:[#allocation2 + $0x2c0] sm:$0xf]  ;;  %v1892_v19 = vld [vmem:[#allocation2 + $0x2cc] sm:$0xf0]  ;;  %v1369_v26 = vor.u32 %v1826_v23, %v1366_v24  ;;  %v1822_v35 = vld [vmem:[#allocation2 + $0xa4] sm:$0xf] }
  0x12   :  { %v1492_v20 = vld [vmem:[#allocation2 + $0x1c0] sm:$0xf]  ;;  %704 = vmatpush.bf16.msra.mxu1 %v1509_v12  ;;  %v1621_v21 = vor.u32 %v1892_v19, %v1620_v18  ;;  %v1860_v22 = vld [vmem:[#allocation2 + $0x1cc] sm:$0xf0]  ;;  %v1350_v36 = vld [vmem:[#allocation2 + $0xb0] sm:$0xf0] }
  0x13   :  { %v1493_v25 = vor.u32 %v1860_v22, %v1492_v20  ;;  %v1348_v27 = vld [vmem:[#allocation2 + $0xa0] sm:$0xf]  ;;  %v1824_v28 = vld [vmem:[#allocation2 + $0xac] sm:$0xf0]  ;;  %691 = vmatpush.bf16.msra.mxu0 %v1365_v17  ;;  %v1353_v42 = vor.u32 %v1822_v35, %v1350_v36  ;;  %v1818_v46 = vld [vmem:[#allocation2 + $0x84] sm:$0xf] }
  0x14   :  { %v1604_v29 = vld [vmem:[#allocation2 + $0x2a0] sm:$0xf]  ;;  %v1349_v30 = vor.u32 %v1824_v28, %v1348_v27  ;;  %v1888_v31 = vld [vmem:[#allocation2 + $0x2ac] sm:$0xf0]  ;;  %719 = vmatpush.bf16.msra.mxu2 %v1621_v21  ;;  %v1334_v47 = vld [vmem:[#allocation2 + $0x90] sm:$0xf0] }
  0x15   :  { %746 = vmatpush.bf16.msrb.mxu3 %v1385_v16  ;;  %v1476_v32 = vld [vmem:[#allocation2 + $0x1a0] sm:$0xf]  ;;  %v1856_v33 = vld [vmem:[#allocation2 + $0x1ac] sm:$0xf0]  ;;  %v1605_v34 = vor.u32 %v1888_v31, %v1604_v29  ;;  %v1337_v54 = vor.u32 %v1818_v46, %v1334_v47  ;;  %v1814_v58 = vld [vmem:[#allocation2 + $0x64] sm:$0xf] }
  0x16   :  { %v1332_v37 = vld [vmem:[#allocation2 + $0x80] sm:$0xf]  ;;  %705 = vmatpush.bf16.msra.mxu1 %v1493_v25  ;;  %v1477_v38 = vor.u32 %v1856_v33, %v1476_v32  ;;  %v1820_v39 = vld [vmem:[#allocation2 + $0x8c] sm:$0xf0]  ;;  %v1318_v59 = vld [vmem:[#allocation2 + $0x70] sm:$0xf0] }
  0x17   :  { %v1588_v40 = vld [vmem:[#allocation2 + $0x280] sm:$0xf]  ;;  %v1884_v41 = vld [vmem:[#allocation2 + $0x28c] sm:$0xf0]  ;;  %692 = vmatpush.bf16.msra.mxu0 %v1349_v30  ;;  %v1333_v45 = vor.u32 %v1820_v39, %v1332_v37  ;;  %v1321_v2 = vor.u32 %v1814_v58, %v1318_v59  ;;  %v1799_v5 = vld [vmem:[%s2105_s0 + $0xc] sm:$0xf] }
  0x18   :  { %v1460_v43 = vld [vmem:[#allocation2 + $0x180] sm:$0xf]  ;;  %v1852_v44 = vld [vmem:[#allocation2 + $0x18c] sm:$0xf0]  ;;  %720 = vmatpush.bf16.msra.mxu2 %v1605_v34  ;;  %v1589_v48 = vor.u32 %v1884_v41, %v1588_v40  ;;  %v1810_v7 = vld [vmem:[#allocation2 + $0x44] sm:$0xf] }
  0x19   :  { %747 = vmatpush.bf16.msrb.mxu3 %v1369_v26  ;;  %v1316_v49 = vld [vmem:[#allocation2 + $0x60] sm:$0xf]  ;;  %v1816_v50 = vld [vmem:[#allocation2 + $0x6c] sm:$0xf0]  ;;  %v1461_v51 = vor.u32 %v1852_v44, %v1460_v43  ;;  %v1302_v8 = vld [vmem:[#allocation2 + $0x50] sm:$0xf0] }
  0x1a   :  { %706 = vmatpush.bf16.msra.mxu1 %v1477_v38  ;;  %v1572_v52 = vld [vmem:[#allocation2 + $0x260] sm:$0xf]  ;;  %v1880_v53 = vld [vmem:[#allocation2 + $0x26c] sm:$0xf0]  ;;  %v1317_v57 = vor.u32 %v1816_v50, %v1316_v49  ;;  %v1262_v9 = vld [vmem:[%s2105_s0 + $0x18] sm:$0xf0]  ;;  %v1305_v18 = vor.u32 %v1810_v7, %v1302_v8 }
  0x1b   :  { %v1444_v55 = vld [vmem:[#allocation2 + $0x160] sm:$0xf]  ;;  %v1848_v56 = vld [vmem:[#allocation2 + $0x16c] sm:$0xf0]  ;;  %693 = vmatpush.bf16.msra.mxu0 %v1333_v45  ;;  %v1573_v60 = vor.u32 %v1880_v53, %v1572_v52  ;;  %v2041_v13 = vor.u32 %v1799_v5, %v1262_v9  ;;  %vm686_vm0 = vcmask 130048  }
  0x1c   :  { %721 = vmatpush.bf16.msra.mxu2 %v1589_v48  ;;  %v1300_v61 = vld [vmem:[#allocation2 + $0x40] sm:$0xf]  ;;  %v1812_v62 = vld [vmem:[#allocation2 + $0x4c] sm:$0xf0]  ;;  %v1445_v63 = vor.u32 %v1848_v56, %v1444_v55  ;;  %v1806_v20 = vld [vmem:[#allocation2 + $0x24] sm:$0xf] }
  0x1d   :  { %748 = vmatpush.bf16.msrb.mxu3 %v1353_v42  ;;  %v1556_v0 = vld [vmem:[#allocation2 + $0x240] sm:$0xf]  ;;  %v1876_v1 = vld [vmem:[#allocation2 + $0x24c] sm:$0xf0]  ;;  %v1301_v6 = vor.u32 %v1812_v62, %v1300_v61  ;;  %v1286_v21 = vld [vmem:[#allocation2 + $0x30] sm:$0xf0] }
  0x1e   :  { %707 = vmatpush.bf16.msra.mxu1 %v1461_v51  ;;  %v1428_v3 = vld [vmem:[#allocation2 + $0x140] sm:$0xf]  ;;  %v1844_v4 = vld [vmem:[#allocation2 + $0x14c] sm:$0xf0]  ;;  %v1557_v10 = vor.u32 %v1876_v1, %v1556_v0  ;;  %1666 = vmatmul.msk.bf16.vlgmr.msra.gmra.mxu3 %vm686_vm0, %v2041_v13  ;;  %v1802_v31 = vld [vmem:[#allocation2 + $0x4] sm:$0xf]  ;;  %v1289_v36 = vor.u32 %v1806_v20, %v1286_v21 }
  0x1f   :  { %694 = vmatpush.bf16.msra.mxu0 %v1317_v57  ;;  %v1284_v11 = vld [vmem:[#allocation2 + $0x20] sm:$0xf]  ;;  %v1808_v12 = vld [vmem:[#allocation2 + $0x2c] sm:$0xf0]  ;;  %v1429_v14 = vor.u32 %v1844_v4, %v1428_v3  ;;  %v1270_v32 = vld [vmem:[#allocation2 + $0x10] sm:$0xf0] }
  0x20   :  { %722 = vmatpush.bf16.msra.mxu2 %v1573_v60  ;;  %v1540_v15 = vld [vmem:[#allocation2 + $0x220] sm:$0xf]  ;;  %v1872_v16 = vld [vmem:[#allocation2 + $0x22c] sm:$0xf0]  ;;  %v1285_v22 = vor.u32 %v1808_v12, %v1284_v11  ;;  %v1862_v33 = vld [vmem:[#allocation2 + $0x1e4] sm:$0xf] }
  0x21   :  { %749 = vmatpush.bf16.msrb.mxu3 %v1337_v54  ;;  %v1412_v17 = vld [vmem:[#allocation2 + $0x120] sm:$0xf]  ;;  %v1840_v19 = vld [vmem:[#allocation2 + $0x12c] sm:$0xf0]  ;;  %v1541_v26 = vor.u32 %v1872_v16, %v1540_v15  ;;  %v1510_v34 = vld [vmem:[#allocation2 + $0x1f0] sm:$0xf0]  ;;  %v1273_v54 = vor.u32 %v1802_v31, %v1270_v32 }
  0x22   :  { %708 = vmatpush.bf16.msra.mxu1 %v1445_v63  ;;  %v1268_v23 = vld [vmem:[#allocation2] sm:$0xf]  ;;  %v1804_v24 = vld [vmem:[#allocation2 + $0xc] sm:$0xf0]  ;;  %v1413_v30 = vor.u32 %v1840_v19, %v1412_v17  ;;  %v1894_v35 = vld [vmem:[#allocation2 + $0x2e4] sm:$0xf]  ;;  %v1513_v45 = vor.u32 %v1862_v33, %v1510_v34 }
  0x23   :  { %695 = vmatpush.bf16.msra.mxu0 %v1301_v6  ;;  %v1524_v25 = vld [vmem:[#allocation2 + $0x200] sm:$0xf]  ;;  %v1868_v27 = vld [vmem:[#allocation2 + $0x20c] sm:$0xf0]  ;;  %v1638_v37 = vld [vmem:[#allocation2 + $0x2f0] sm:$0xf0]  ;;  %v1269_v40 = vor.u32 %v1804_v24, %v1268_v23 }
  0x24   :  { %723 = vmatpush.bf16.msra.mxu2 %v1557_v10  ;;  %v1396_v28 = vld [vmem:[#allocation2 + $0x100] sm:$0xf]  ;;  %v1836_v29 = vld [vmem:[#allocation2 + $0x10c] sm:$0xf0]  ;;  %v1898_v38 = vld [vmem:[#allocation2 + $0x304] sm:$0xf]  ;;  %v1525_v44 = vor.u32 %v1868_v27, %v1524_v25  ;;  %v1641_v55 = vor.u32 %v1894_v35, %v1638_v37 }
  0x25   :  { %750 = vmatpush.bf16.msrb.mxu3 %v1321_v2  ;;  %v1654_v39 = vld [vmem:[#allocation2 + $0x310] sm:$0xf0]  ;;  %v1388_v41 = vld [vmem:[#allocation2 + $0xe8] sm:$0xf]  ;;  %v1833_v42 = vld [vmem:[#allocation2 + $0xf4] sm:$0xf0]  ;;  %v1397_v49 = vor.u32 %v1836_v29, %v1396_v28 }
  0x26   :  { %709 = vmatpush.bf16.msra.mxu1 %v1429_v14  ;;  %v1260_v43 = vld [vmem:[%s2105_s0 + $0x8] sm:$0xf]  ;;  %v1801_v46 = vld [vmem:[%s2105_s0 + $0x14] sm:$0xf0]  ;;  %v1657_v50 = vor.u32 %v1898_v38, %v1654_v39  ;;  %v1252_v51 = vld [vmem:[%s2105_s0] sm:$0xf]  ;;  %v1389_v59 = vor.u32 %v1833_v42, %v1388_v41 }
  0x27   :  { %696 = vmatpush.bf16.msra.mxu0 %v1285_v22  ;;  %v1516_v47 = vld [vmem:[#allocation2 + $0x1e8] sm:$0xf]  ;;  %v1865_v48 = vld [vmem:[#allocation2 + $0x1f4] sm:$0xf0]  ;;  %v1800_v52 = vld [vmem:[%s2105_s0 + $0xc] sm:$0xf0]  ;;  %v2063_v60 = vor.u32 %v1801_v46, %v1260_v43 }
  0x28   :  { %724 = vmatpush.bf16.msra.mxu2 %v1541_v26  ;;  %v1858_v53 = vld [vmem:[#allocation2 + $0x1c4] sm:$0xf]  ;;  %v1494_v56 = vld [vmem:[#allocation2 + $0x1d0] sm:$0xf0]  ;;  %v1517_v63 = vor.u32 %v1865_v48, %v1516_v47  ;;  %v2065_v0 = vor.u32 %v1800_v52, %v1252_v51  ;;  %v1372_v1 = vld [vmem:[#allocation2 + $0xc8] sm:$0xf] }
  0x29   :  { %751 = vmatpush.bf16.msrb.mxu3 %v1305_v18  ;;  %v1798_v57 = vld [vmem:[%s2105_s0 + $0x4] sm:$0xf]  ;;  %v1254_v58 = vld [vmem:[%s2105_s0 + $0x10] sm:$0xf0]  ;;  %v1829_v2 = vld [vmem:[#allocation2 + $0xd4] sm:$0xf0]  ;;  %v1497_v3 = vor.u32 %v1858_v53, %v1494_v56 }
  0x2a   :  { %710 = vmatpush.bf16.msra.mxu1 %v1413_v30  ;;  %v1890_v61 = vld [vmem:[#allocation2 + $0x2c4] sm:$0xf]  ;;  %v1622_v62 = vld [vmem:[#allocation2 + $0x2d0] sm:$0xf0]  ;;  %v2067_v4 = vor.u32 %v1798_v57, %v1254_v58  ;;  %v1500_v5 = vld [vmem:[#allocation2 + $0x1c8] sm:$0xf]  ;;  %v1373_v10 = vor.u32 %v1829_v2, %v1372_v1 }
  0x2b   :  { %697 = vmatpush.bf16.msra.mxu0 %v1269_v40  ;;  %v1861_v6 = vld [vmem:[#allocation2 + $0x1d4] sm:$0xf0]  ;;  %v1625_v7 = vor.u32 %v1890_v61, %v1622_v62  ;;  %v1854_v8 = vld [vmem:[#allocation2 + $0x1a4] sm:$0xf]  ;;  %v1478_v9 = vld [vmem:[#allocation2 + $0x1b0] sm:$0xf0] }
  0x2c   :  { %725 = vmatpush.bf16.msra.mxu2 %v1525_v44  ;;  %v1886_v11 = vld [vmem:[#allocation2 + $0x2a4] sm:$0xf]  ;;  %v1606_v12 = vld [vmem:[#allocation2 + $0x2b0] sm:$0xf0]  ;;  %v1501_v14 = vor.u32 %v1861_v6, %v1500_v5  ;;  %v1356_v15 = vld [vmem:[#allocation2 + $0xa8] sm:$0xf]  ;;  %v1481_v17 = vor.u32 %v1854_v8, %v1478_v9 }
  0x2d   :  { %752 = vmatpush.bf16.msrb.mxu3 %v1289_v36  ;;  %v1825_v16 = vld [vmem:[#allocation2 + $0xb4] sm:$0xf0]  ;;  %v1484_v18 = vld [vmem:[#allocation2 + $0x1a8] sm:$0xf]  ;;  %v1609_v20 = vor.u32 %v1886_v11, %v1606_v12  ;;  %v1850_v21 = vld [vmem:[#allocation2 + $0x184] sm:$0xf] }
  0x2e   :  { %711 = vmatpush.bf16.msra.mxu1 %v1397_v49  ;;  %698 = vmatmul.bf16.vlgmr.msra.gmra.mxu0 %v2065_v0  ;;  %v1857_v19 = vld [vmem:[#allocation2 + $0x1b4] sm:$0xf0]  ;;  %v1462_v22 = vld [vmem:[#allocation2 + $0x190] sm:$0xf0]  ;;  %v1357_v23 = vor.u32 %v1825_v16, %v1356_v15  ;;  %v1882_v24 = vld [vmem:[#allocation2 + $0x284] sm:$0xf] }
  0x2f   :  { %760 = vmatpush.bf16.msrb.mxu0 %v1513_v45  ;;  %726 = vmatmul.bf16.vlgmr.msra.gmra.mxu2 %v2063_v60  ;;  %v1590_v25 = vld [vmem:[#allocation2 + $0x290] sm:$0xf0]  ;;  %v1485_v26 = vor.u32 %v1857_v19, %v1484_v18  ;;  %v1340_v27 = vld [vmem:[#allocation2 + $0x88] sm:$0xf]  ;;  %v1821_v28 = vld [vmem:[#allocation2 + $0x94] sm:$0xf0]  ;;  %v1465_v29 = vor.u32 %v1850_v21, %v1462_v22 }
  0x30   :  { %795 = vmatpush.bf16.msrb.mxu2 %v1657_v50  ;;  %v1468_v30 = vld [vmem:[#allocation2 + $0x188] sm:$0xf]  ;;  %v1853_v31 = vld [vmem:[#allocation2 + $0x194] sm:$0xf0]  ;;  %v1593_v32 = vor.u32 %v1882_v24, %v1590_v25  ;;  %v1846_v33 = vld [vmem:[#allocation2 + $0x164] sm:$0xf]  ;;  %v1341_v35 = vor.u32 %v1821_v28, %v1340_v27 }
  0x31   :  { %753 = vmatpush.bf16.msrb.mxu3 %v1273_v54  ;;  %712 = vmatmul.bf16.vlgmr.msra.gmra.mxu1 %v2067_v4  ;;  %v1446_v34 = vld [vmem:[#allocation2 + $0x170] sm:$0xf0]  ;;  %v1878_v36 = vld [vmem:[#allocation2 + $0x264] sm:$0xf]  ;;  %v1469_v38 = vor.u32 %v1853_v31, %v1468_v30  ;;  %v1324_v39 = vld [vmem:[#allocation2 + $0x68] sm:$0xf] }
  0x32   :  { %774 = vmatpush.bf16.msrb.mxu1 %v1641_v55  ;;  %v1574_v37 = vld [vmem:[#allocation2 + $0x270] sm:$0xf0]  ;;  %v1817_v40 = vld [vmem:[#allocation2 + $0x74] sm:$0xf0]  ;;  %v1449_v41 = vor.u32 %v1846_v33, %v1446_v34  ;;  %v1452_v42 = vld [vmem:[#allocation2 + $0x168] sm:$0xf] }
  0x33   :  { %761 = vmatpush.bf16.msrb.mxu0 %v1497_v3  ;;  %v1849_v43 = vld [vmem:[#allocation2 + $0x174] sm:$0xf0]  ;;  %v1577_v44 = vor.u32 %v1878_v36, %v1574_v37  ;;  %v1842_v45 = vld [vmem:[#allocation2 + $0x144] sm:$0xf]  ;;  %v1430_v46 = vld [vmem:[#allocation2 + $0x150] sm:$0xf0]  ;;  %v1325_v47 = vor.u32 %v1817_v40, %v1324_v39 }
  0x34   :  { %816 = vmatpush.bf16.msra.mxu2 %v1517_v63  ;;  %754 = vmatmul.bf16.vlgmr.msrb.gmra.mxu3 %v2065_v0  ;;  %v1874_v48 = vld [vmem:[#allocation2 + $0x244] sm:$0xf]  ;;  %v1558_v49 = vld [vmem:[#allocation2 + $0x250] sm:$0xf0]  ;;  %v1453_v50 = vor.u32 %v1849_v43, %v1452_v42  ;;  %v1308_v51 = vld [vmem:[#allocation2 + $0x48] sm:$0xf]  ;;  %v1433_v53 = vor.u32 %v1842_v45, %v1430_v46 }
  0x35   :  { %802 = vmatpush.bf16.msra.mxu3 %v1389_v59  ;;  %v1813_v52 = vld [vmem:[#allocation2 + $0x54] sm:$0xf0]  ;;  %v1436_v54 = vld [vmem:[#allocation2 + $0x148] sm:$0xf]  ;;  %v1561_v56 = vor.u32 %v1874_v48, %v1558_v49  ;;  %v1838_v57 = vld [vmem:[#allocation2 + $0x124] sm:$0xf] }
  0x36   :  { %775 = vmatpush.bf16.msrb.mxu1 %v1625_v7  ;;  %v1845_v55 = vld [vmem:[#allocation2 + $0x154] sm:$0xf0]  ;;  %v1414_v58 = vld [vmem:[#allocation2 + $0x130] sm:$0xf0]  ;;  %v1309_v59 = vor.u32 %v1813_v52, %v1308_v51  ;;  %v1870_v61 = vld [vmem:[#allocation2 + $0x224] sm:$0xf] }
  0x37   :  { %762 = vmatpush.bf16.msrb.mxu0 %v1481_v17  ;;  %v1542_v62 = vld [vmem:[#allocation2 + $0x230] sm:$0xf0]  ;;  %v1437_v63 = vor.u32 %v1845_v55, %v1436_v54  ;;  %v1292_v1 = vld [vmem:[#allocation2 + $0x28] sm:$0xf]  ;;  %v1809_v2 = vld [vmem:[#allocation2 + $0x34] sm:$0xf0]  ;;  %v1417_v3 = vor.u32 %v1838_v57, %v1414_v58 }
  0x38   :  { %817 = vmatpush.bf16.msra.mxu2 %v1501_v14  ;;  %v1420_v5 = vld [vmem:[#allocation2 + $0x128] sm:$0xf]  ;;  %v1841_v6 = vld [vmem:[#allocation2 + $0x134] sm:$0xf0]  ;;  %v1834_v7 = vld [vmem:[#allocation2 + $0x104] sm:$0xf]  ;;  %v1545_v8 = vor.u32 %v1870_v61, %v1542_v62  ;;  %v1293_v12 = vor.u32 %v1809_v2, %v1292_v1 }
  0x39   :  { %803 = vmatpush.bf16.msra.mxu3 %v1373_v10  ;;  %v1398_v9 = vld [vmem:[#allocation2 + $0x110] sm:$0xf0]  ;;  %v1866_v10 = vld [vmem:[#allocation2 + $0x204] sm:$0xf]  ;;  %v1276_v14 = vld [vmem:[#allocation2 + $0x8] sm:$0xf]  ;;  %v1421_v17 = vor.u32 %v1841_v6, %v1420_v5 }
  0x3a   :  { %776 = vmatpush.bf16.msrb.mxu1 %v1609_v20  ;;  %v1526_v11 = vld [vmem:[#allocation2 + $0x210] sm:$0xf0]  ;;  %v1644_v15 = vld [vmem:[#allocation2 + $0x2e8] sm:$0xf]  ;;  %v1897_v16 = vld [vmem:[#allocation2 + $0x2f4] sm:$0xf0]  ;;  %v1401_v21 = vor.u32 %v1834_v7, %v1398_v9 }
  0x3b   :  { %763 = vmatpush.bf16.msrb.mxu0 %v1465_v29  ;;  %v1805_v18 = vld [vmem:[#allocation2 + $0x14] sm:$0xf0]  ;;  %v1660_v19 = vld [vmem:[#allocation2 + $0x308] sm:$0xf]  ;;  %v1831_v22 = vld [vmem:[#allocation2 + $0xec] sm:$0xf]  ;;  %v1529_v24 = vor.u32 %v1866_v10, %v1526_v11  ;;  %v1645_v25 = vor.u32 %v1897_v16, %v1644_v15 }
  0x3c   :  { %818 = vmatpush.bf16.msra.mxu2 %v1485_v26  ;;  %v1901_v20 = vld [vmem:[#allocation2 + $0x314] sm:$0xf0]  ;;  %v1404_v26 = vld [vmem:[#allocation2 + $0x108] sm:$0xf]  ;;  %v1895_v28 = vld [vmem:[#allocation2 + $0x2ec] sm:$0xf]  ;;  %v1277_v29 = vor.u32 %v1805_v18, %v1276_v14 }
  0x3d   :  { %804 = vmatpush.bf16.msra.mxu3 %v1357_v23  ;;  %v1390_v23 = vld [vmem:[#allocation2 + $0xf8] sm:$0xf0]  ;;  %v1837_v27 = vld [vmem:[#allocation2 + $0x114] sm:$0xf0]  ;;  %v1661_v30 = vor.u32 %v1901_v20, %v1660_v19  ;;  %v1891_v42 = vld [vmem:[#allocation2 + $0x2cc] sm:$0xf] }
  0x3e   :  { %777 = vmatpush.bf16.msrb.mxu1 %v1593_v32  ;;  %v1646_v31 = vld [vmem:[#allocation2 + $0x2f8] sm:$0xf0]  ;;  %v1628_v32 = vld [vmem:[#allocation2 + $0x2c8] sm:$0xf]  ;;  %v1893_v33 = vld [vmem:[#allocation2 + $0x2d4] sm:$0xf0]  ;;  %v1393_v34 = vor.u32 %v1831_v22, %v1390_v23  ;;  %v1405_v37 = vor.u32 %v1837_v27, %v1404_v26 }
  0x3f   :  { %764 = vmatpush.bf16.msrb.mxu0 %v1449_v41  ;;  %1667 = vmatmul.msk.bf16.vlgmr.msrb.gmra.mxu2 %vm686_vm0, %v2041_v13  ;;  %v1518_v36 = vld [vmem:[#allocation2 + $0x1f8] sm:$0xf0]  ;;  %v1649_v40 = vor.u32 %v1895_v28, %v1646_v31  ;;  %v1629_v41 = vor.u32 %v1893_v33, %v1628_v32  ;;  %v1612_v45 = vld [vmem:[#allocation2 + $0x2a8] sm:$0xf]  ;;  %v1889_v46 = vld [vmem:[#allocation2 + $0x2b4] sm:$0xf0] }
  0x40   :  { %819 = vmatpush.bf16.msra.mxu2 %v1469_v38  ;;  %v1827_v38 = vld [vmem:[#allocation2 + $0xcc] sm:$0xf]  ;;  %v1374_v39 = vld [vmem:[#allocation2 + $0xd8] sm:$0xf0]  ;;  %v1596_v57 = vld [vmem:[#allocation2 + $0x288] sm:$0xf] }
  0x41   :  { %805 = vmatpush.bf16.msra.mxu3 %v1341_v35  ;;  %v1863_v35 = vld [vmem:[#allocation2 + $0x1ec] sm:$0xf]  ;;  %v1502_v49 = vld [vmem:[#allocation2 + $0x1d8] sm:$0xf0]  ;;  %v1885_v58 = vld [vmem:[#allocation2 + $0x294] sm:$0xf0] }
  0x42   :  { %778 = vmatpush.bf16.msrb.mxu1 %v1577_v44  ;;  %v1521_v43 = vor.u32 %v1863_v35, %v1518_v36  ;;  %v1630_v44 = vld [vmem:[#allocation2 + $0x2d8] sm:$0xf0]  ;;  %v1859_v48 = vld [vmem:[#allocation2 + $0x1cc] sm:$0xf]  ;;  %v1881_v9 = vld [vmem:[#allocation2 + $0x274] sm:$0xf0] }
  0x43   :  { %765 = vmatpush.bf16.msrb.mxu0 %v1433_v53  ;;  %v1358_v51 = vld [vmem:[#allocation2 + $0xb8] sm:$0xf0]  ;;  %v1633_v52 = vor.u32 %v1891_v42, %v1630_v44  ;;  %v1613_v53 = vor.u32 %v1889_v46, %v1612_v45  ;;  %v1887_v54 = vld [vmem:[#allocation2 + $0x2ac] sm:$0xf]  ;;  %v1505_v55 = vor.u32 %v1859_v48, %v1502_v49  ;;  %v1877_v22 = vld [vmem:[#allocation2 + $0x254] sm:$0xf0] }
  0x44   :  { %820 = vmatpush.bf16.msra.mxu2 %v1453_v50  ;;  %v1823_v50 = vld [vmem:[#allocation2 + $0xac] sm:$0xf]  ;;  %v1486_v62 = vld [vmem:[#allocation2 + $0x1b8] sm:$0xf0]  ;;  %v1548_v33 = vld [vmem:[#allocation2 + $0x228] sm:$0xf] }
  0x45   :  { %806 = vmatpush.bf16.msra.mxu3 %v1325_v47  ;;  %v1377_v47 = vor.u32 %v1827_v38, %v1374_v39  ;;  %v1855_v61 = vld [vmem:[#allocation2 + $0x1ac] sm:$0xf]  ;;  %v1342_v1 = vld [vmem:[#allocation2 + $0x98] sm:$0xf0]  ;;  %v1532_v45 = vld [vmem:[#allocation2 + $0x208] sm:$0xf] }
  0x46   :  { %779 = vmatpush.bf16.msrb.mxu1 %v1561_v56  ;;  %v1614_v56 = vld [vmem:[#allocation2 + $0x2b8] sm:$0xf0]  ;;  %v1883_v5 = vld [vmem:[#allocation2 + $0x28c] sm:$0xf]  ;;  %v1489_v6 = vor.u32 %v1855_v61, %v1486_v62  ;;  %v1869_v46 = vld [vmem:[#allocation2 + $0x214] sm:$0xf0] }
  0x47   :  { %766 = vmatpush.bf16.msrb.mxu0 %v1417_v3  ;;  %v1617_v2 = vor.u32 %v1887_v54, %v1614_v56  ;;  %v1597_v3 = vor.u32 %v1885_v58, %v1596_v57  ;;  %v1598_v7 = vld [vmem:[#allocation2 + $0x298] sm:$0xf0]  ;;  %v1851_v11 = vld [vmem:[#allocation2 + $0x18c] sm:$0xf] }
  0x48   :  { %821 = vmatpush.bf16.msra.mxu2 %v1437_v63  ;;  %v1819_v63 = vld [vmem:[#allocation2 + $0x8c] sm:$0xf]  ;;  %v1326_v15 = vld [vmem:[#allocation2 + $0x78] sm:$0xf0]  ;;  %v1601_v16 = vor.u32 %v1883_v5, %v1598_v7  ;;  %v1908_v5 = vld [vmem:[#allocation4 + $0x30] sm:$0xff] }
  0x49   :  { %807 = vmatpush.bf16.msra.mxu3 %v1309_v59  ;;  %v1361_v59 = vor.u32 %v1823_v50, %v1358_v51  ;;  %v1345_v10 = vor.u32 %v1819_v63, %v1342_v1  ;;  %v1815_v14 = vld [vmem:[#allocation2 + $0x6c] sm:$0xf]  ;;  %v1582_v20 = vld [vmem:[#allocation2 + $0x278] sm:$0xf0]  ;;  %v1906_v7 = vld [vmem:[#allocation4 + $0x20] sm:$0xff] }
  0x4a   :  { %780 = vmatpush.bf16.msrb.mxu1 %v1545_v8  ;;  %v1580_v8 = vld [vmem:[#allocation2 + $0x268] sm:$0xf]  ;;  %v1879_v18 = vld [vmem:[#allocation2 + $0x26c] sm:$0xf]  ;;  %v1329_v23 = vor.u32 %v1815_v14, %v1326_v15  ;;  %v1310_v27 = vld [vmem:[#allocation2 + $0x58] sm:$0xf0] }
  0x4b   :  { %767 = vmatpush.bf16.msrb.mxu0 %v1401_v21  ;;  %v1564_v21 = vld [vmem:[#allocation2 + $0x248] sm:$0xf]  ;;  %v1811_v26 = vld [vmem:[#allocation2 + $0x4c] sm:$0xf]  ;;  %v1585_v28 = vor.u32 %v1879_v18, %v1582_v20  ;;  %v1566_v32 = vld [vmem:[#allocation2 + $0x258] sm:$0xf0] }
  0x4c   :  { %822 = vmatpush.bf16.msra.mxu2 %v1421_v17  ;;  %v1581_v17 = vor.u32 %v1881_v9, %v1580_v8  ;;  %v1313_v35 = vor.u32 %v1811_v26, %v1310_v27  ;;  %v1843_v36 = vld [vmem:[#allocation2 + $0x14c] sm:$0xf]  ;;  %v1294_v39 = vld [vmem:[#allocation2 + $0x38] sm:$0xf0]  ;;  %v1904_v9 = vld [vmem:[#allocation4 + $0x10] sm:$0xff] }
  0x4d   :  { %808 = vmatpush.bf16.msra.mxu3 %v1293_v12  ;;  %v1470_v12 = vld [vmem:[#allocation2 + $0x198] sm:$0xf0]  ;;  %v1807_v38 = vld [vmem:[#allocation2 + $0x2c] sm:$0xf]  ;;  %v1912_v20 = vld [vmem:[#allocation4 + $0x50] sm:$0xff] }
  0x4e   :  { %781 = vmatpush.bf16.msrb.mxu1 %v1529_v24  ;;  %768 = vmatmul.bf16.vlgmr.msrb.gmra.mxu0 %v2067_v4  ;;  %v1473_v19 = vor.u32 %v1851_v11, %v1470_v12  ;;  %v1847_v24 = vld [vmem:[#allocation2 + $0x16c] sm:$0xf]  ;;  %v1297_v48 = vor.u32 %v1807_v38, %v1294_v39  ;;  %v1422_v49 = vld [vmem:[#allocation2 + $0x138] sm:$0xf0]  ;;  %v1914_v12 = vld [vmem:[#allocation4 + $0x60] sm:$0xff] }
  0x4f   :  { %830 = vmatpush.bf16.msra.mxu0 %v1645_v25  ;;  %v1454_v25 = vld [vmem:[#allocation2 + $0x178] sm:$0xf0]  ;;  %v1871_v42 = vld [vmem:[#allocation2 + $0x22c] sm:$0xf] }
  0x50   :  { %823 = vmatpush.bf16.msra.mxu2 %v1405_v37  ;;  %v1457_v31 = vor.u32 %v1847_v24, %v1454_v25  ;;  %v1438_v37 = vld [vmem:[#allocation2 + $0x158] sm:$0xf0]  ;;  %v1899_v50 = vld [vmem:[#allocation2 + $0x30c] sm:$0xf] }
  0x51   :  { %809 = vmatpush.bf16.msra.mxu3 %v1277_v29  ;;  %782 = vmatmul.bf16.vlgmr.msrb.gmra.mxu1 %v2063_v60  ;;  %v1565_v29 = vor.u32 %v1877_v22, %v1564_v21  ;;  %v1441_v44 = vor.u32 %v1843_v36, %v1438_v37  ;;  %v1662_v51 = vld [vmem:[#allocation2 + $0x318] sm:$0xf0]  ;;  %v1867_v57 = vld [vmem:[#allocation2 + $0x20c] sm:$0xf] }
  0x52   :  { %851 = vmatpush.bf16.msra.mxu1 %v1661_v30  ;;  %v1875_v30 = vld [vmem:[#allocation2 + $0x24c] sm:$0xf]  ;;  %v1534_v58 = vld [vmem:[#allocation2 + $0x218] sm:$0xf0] }
  0x53   :  { %831 = vmatpush.bf16.msra.mxu0 %v1629_v41  ;;  %824 = vmatmul.bf16.vlgmr.msra.gmra.mxu2 %v2067_v4  ;;  %v1835_v62 = vld [vmem:[#allocation2 + $0x10c] sm:$0xf]  ;;  %v1406_v63 = vld [vmem:[#allocation2 + $0x118] sm:$0xf0] }
  0x54   :  { %886 = vmatpush.bf16.msrb.mxu2 %v1649_v40  ;;  %810 = vmatmul.bf16.vlgmr.msra.gmra.mxu3 %v2065_v0  ;;  %v1569_v40 = vor.u32 %v1875_v30, %v1566_v32  ;;  %v1909_v1 = vld [vmem:[#allocation4 + $0x38] sm:$0xff]  ;;  %v1910_v30 = vld [vmem:[#allocation4 + $0x40] sm:$0xff]  ;;  %v1923_v37 = vld [vmem:[#allocation4 + $0xa8] sm:$0xff] }
  0x55   :  { %858 = vmatpush.bf16.msrb.mxu3 %v1393_v34  ;;  %v1873_v34 = vld [vmem:[#allocation2 + $0x234] sm:$0xf0] }
  0x56   :  { %872 = vmatpush.bf16.msrb.mxu1 %v1521_v43  ;;  %v1549_v41 = vor.u32 %v1873_v34, %v1548_v33  ;;  %v1550_v43 = vld [vmem:[#allocation2 + $0x238] sm:$0xf0] }
  0x57   :  { %832 = vmatpush.bf16.msra.mxu0 %v1613_v53  ;;  %v1278_v53 = vld [vmem:[#allocation2 + $0x18] sm:$0xf0]  ;;  %v1553_v54 = vor.u32 %v1871_v42, %v1550_v43  ;;  %v1922_v43 = vld [vmem:[#allocation4 + $0xa0] sm:$0xff] }
  0x58   :  { %887 = vmatpush.bf16.msrb.mxu2 %v1633_v52  ;;  %v1803_v52 = vld [vmem:[#allocation2 + $0xc] sm:$0xf]  ;;  %v1905_v8 = vld [vmem:[#allocation4 + $0x18] sm:$0xff] }
  0x59   :  { %859 = vmatpush.bf16.msrb.mxu3 %v1377_v47  ;;  %v1839_v47 = vld [vmem:[#allocation2 + $0x12c] sm:$0xf]  ;;  %v1281_v61 = vor.u32 %v1803_v52, %v1278_v53  ;;  %v1917_v11 = vld [vmem:[#allocation4 + $0x78] sm:$0xff]  ;;  %v1920_v53 = vld [vmem:[#allocation4 + $0x90] sm:$0xff] }
  0x5a   :  { %873 = vmatpush.bf16.msrb.mxu1 %v1505_v55  ;;  %v1533_v55 = vor.u32 %v1869_v46, %v1532_v45  ;;  %v1425_v56 = vor.u32 %v1839_v47, %v1422_v49  ;;  %v1913_v15 = vld [vmem:[#allocation4 + $0x58] sm:$0xff] }
  0x5b   :  { %833 = vmatpush.bf16.msra.mxu0 %v1597_v3  ;;  %v1409_v3 = vor.u32 %v1835_v62, %v1406_v63  ;;  %v1921_v46 = vld [vmem:[#allocation4 + $0x98] sm:$0xff] }
  0x5c   :  { %888 = vmatpush.bf16.msrb.mxu2 %v1617_v2  ;;  %v1537_v2 = vor.u32 %v1867_v57, %v1534_v58  ;;  %v1919_v57 = vld [vmem:[#allocation4 + $0x88] sm:$0xff] }
  0x5d   :  { %860 = vmatpush.bf16.msrb.mxu3 %v1361_v59  ;;  %v1665_v59 = vor.u32 %v1899_v50, %v1662_v51 }
  0x5e   :  { %874 = vmatpush.bf16.msrb.mxu1 %v1489_v6  ;;  %v1907_v6 = vld [vmem:[#allocation4 + $0x28] sm:$0xff] }
  0x5f   :  { %834 = vmatpush.bf16.msra.mxu0 %v1581_v17 }
  0x60   :  { %889 = vmatpush.bf16.msrb.mxu2 %v1601_v16 }
  0x61   :  { %861 = vmatpush.bf16.msrb.mxu3 %v1345_v10  ;;  %1668 = vmatmul.msk.bf16.vlgmr.msra.gmra.mxu1 %vm686_vm0, %v2041_v13  ;;  %v1903_v10 = vld [vmem:[#allocation4 + $0x8] sm:$0xff] }
  0x62   :  { %875 = vmatpush.bf16.msrb.mxu1 %v1473_v19 }
  0x63   :  { %835 = vmatpush.bf16.msra.mxu0 %v1565_v29 }
  0x64   :  { %890 = vmatpush.bf16.msrb.mxu2 %v1585_v28  ;;  %v1925_v28 = vld [vmem:[#allocation4 + $0xb8] sm:$0xff] }
  0x65   :  { %862 = vmatpush.bf16.msrb.mxu3 %v1329_v23  ;;  %v1911_v23 = vld [vmem:[#allocation4 + $0x48] sm:$0xff] }
  0x66   :  { %876 = vmatpush.bf16.msrb.mxu1 %v1457_v31 }
  0x67   :  { %836 = vmatpush.bf16.msra.mxu0 %v1549_v41 }
  0x68   :  { %891 = vmatpush.bf16.msrb.mxu2 %v1569_v40 }
  0x69   :  { %863 = vmatpush.bf16.msrb.mxu3 %v1313_v35  ;;  %v1924_v35 = vld [vmem:[#allocation4 + $0xb0] sm:$0xff] }
  0x6a   :  { %877 = vmatpush.bf16.msrb.mxu1 %v1441_v44  ;;  %v1933_v44 = vld [vmem:[#allocation4 + $0xf8] sm:$0xff] }
  0x6b   :  { %837 = vmatpush.bf16.msra.mxu0 %v1533_v55 }
  0x6c   :  { %892 = vmatpush.bf16.msrb.mxu2 %v1553_v54  ;;  %v1931_v54 = vld [vmem:[#allocation4 + $0xe8] sm:$0xff] }
  0x6d   :  { %864 = vmatpush.bf16.msrb.mxu3 %v1297_v48  ;;  %v1932_v48 = vld [vmem:[#allocation4 + $0xf0] sm:$0xff] }
  0x6e   :  { %878 = vmatpush.bf16.msrb.mxu1 %v1425_v56  ;;  %838 = vmatmul.bf16.vlgmr.msra.gmra.mxu0 %v2063_v60 }
  0x6f   :  { %907 = vmatpush.bf16.msrb.mxu0 %v1665_v59  ;;  %v1930_v59 = vld [vmem:[#allocation4 + $0xe0] sm:$0xff] }
  0x70   :  { %893 = vmatpush.bf16.msrb.mxu2 %v1537_v2 }
  0x71   :  { %865 = vmatpush.bf16.msrb.mxu3 %v1281_v61 }
  0x72   :  { %879 = vmatpush.bf16.msrb.mxu1 %v1409_v3 }
  0x73   :  { %894 = vmatmul.bf16.vlgmr.msrb.gmra.mxu2 %v2063_v60  ;;  %1200 = vmatpush.bf16.msra.mxu0 %v1917_v11  ;;  %v1916_v60 = vld [vmem:[#allocation4 + $0x70] sm:$0xff] }
  0x74   :  { %866 = vmatmul.bf16.vlgmr.msrb.gmra.mxu3 %v2065_v0  ;;  %v1902_v0 = vld [vmem:[#allocation4] sm:$0xff]  ;;  %1228 = vmatpush.bf16.msra.mxu2 %v1933_v44 }
  0x75   :  { %1186 = vmatpush.bf16.msra.mxu3 %v1909_v1  ;;  %880 = vmatmul.bf16.vlgmr.msrb.gmra.mxu1 %v2067_v4  ;;  %v1915_v4 = vld [vmem:[#allocation4 + $0x68] sm:$0xff]  ;;  %v1918_v1 = vld [vmem:[#allocation4 + $0x80] sm:$0xff] }
  0x76   :  { %1214 = vmatpush.bf16.msra.mxu1 %v1925_v28 }
  0x77   :  { %1201 = vmatpush.bf16.msra.mxu0 %v1916_v60  ;;  %v1927_v60 = vld [vmem:[#allocation4 + $0xc8] sm:$0xff] }
  0x78   :  { %1229 = vmatpush.bf16.msra.mxu2 %v1932_v48 }
  0x79   :  { %1187 = vmatpush.bf16.msra.mxu3 %v1908_v5  ;;  %v1929_v5 = vld [vmem:[#allocation4 + $0xd8] sm:$0xff] }
  0x7a   :  { %1215 = vmatpush.bf16.msra.mxu1 %v1924_v35 }
  0x7b   :  { %1202 = vmatpush.bf16.msra.mxu0 %v1915_v4 }
  0x7c   :  { %1230 = vmatpush.bf16.msra.mxu2 %v1931_v54 }
  0x7d   :  { %1188 = vmatpush.bf16.msra.mxu3 %v1907_v6 }
  0x7e   :  { %1669 = vmatmul.msk.bf16.vlgmr.msrb.gmra.mxu0 %vm686_vm0, %v2041_v13  ;;  %v2090_v13 = vld [vmem:[%s2107_s2] sm:$0xf]  ;;  %1216 = vmatpush.bf16.msra.mxu1 %v1923_v37 }
  0x7f   :  { %1203 = vmatpush.bf16.msra.mxu0 %v1914_v12  ;;  %v159_v14 = vperm.slane %v2090_v13, 0  ;;  %v160_v42 = vperm.slane %v2090_v13, 1  ;;  %v161_v12 = vperm.slane %v2090_v13, 2 }
  0x80   :  { %1231 = vmatpush.bf16.msra.mxu2 %v1930_v59 }
  0x81   :  { %1189 = vmatpush.bf16.msra.mxu3 %v1906_v7 }
  0x82   :  { %1217 = vmatpush.bf16.msra.mxu1 %v1922_v43 }
  0x83   :  { %1204 = vmatpush.bf16.msra.mxu0 %v1913_v15 }
  0x84   :  { %1232 = vmatpush.bf16.msra.mxu2 %v1929_v5 }
  0x85   :  { %1190 = vmatpush.bf16.msra.mxu3 %v1905_v8 }
  0x86   :  { %1218 = vmatpush.bf16.msra.mxu1 %v1921_v46 }
  0x87   :  { %1205 = vmatpush.bf16.msra.mxu0 %v1912_v20 }
  0x89   :  { %1191 = vmatpush.bf16.msra.mxu3 %v1904_v9  ;;  %v1928_v9 = vld [vmem:[#allocation4 + $0xd0] sm:$0xff] }
  0x8a   :  { %1219 = vmatpush.bf16.msra.mxu1 %v1920_v53  ;;  %1233 = vmatpush.bf16.msra.mxu2 %v1928_v9 }
  0x8b   :  { %1206 = vmatpush.bf16.msra.mxu0 %v1911_v23 }
  0x8d   :  { %1192 = vmatpush.bf16.msra.mxu3 %v1903_v10 }
  0x8e   :  { %1220 = vmatpush.bf16.msra.mxu1 %v1919_v57  ;;  %1234 = vmatpush.bf16.msra.mxu2 %v1927_v60 }
  0x8f   :  { %1207 = vmatpush.bf16.msra.mxu0 %v1910_v30 }
  0x91   :  { %1193 = vmatpush.bf16.msra.mxu3 %v1902_v0 }
  0x92   :  { %1221 = vmatpush.bf16.msra.mxu1 %v1918_v1 }
  0xa1   :  { %v741_v18 = vpop.f32.mrf.mxu3 }
  0xa9   :  { %v743_v31 = vpop.f32.mrf.mxu3 }
  0xab   :  { %v699_v16 = vpop.f32.mrf.mxu0 }
  0xac   :  { %v700_v19 = vadd.f32 %v699_v16, %v159_v14 }
  0xae   :  { %v713_v17 = vpop.f32.mrf.mxu1 }
  0xaf   :  { %v714_v22 = vadd.f32 %v713_v17, %v700_v19 }
  0xb2   :  { %v727_v21 = vpop.f32.mrf.mxu2 }
  0xb3   :  { %v701_v24 = vpop.f32.mrf.mxu0  ;;  %v728_v27 = vadd.f32 %v727_v21, %v714_v22 }
  0xb4   :  { %v702_v25 = vadd.f32 %v701_v24, %v159_v14  ;;  %v1926_v14 = vld [vmem:[#allocation4 + $0xc0] sm:$0xff] }
  0xb5   :  { %v742_v33 = vadd.f32 %v741_v18, %v728_v27  ;;  %1235 = vmatpush.bf16.msra.mxu2 %v1926_v14 }
  0xb6   :  { %v715_v26 = vpop.f32.mrf.mxu1 }
  0xb7   :  { %v716_v29 = vadd.f32 %v715_v26, %v702_v25  ;;  %v914_v38 = vmax.f32 %v742_v33, 0.0  ;;  %v755_v41 = vpop.f32.mrf.mxu3  ;;  %v162_v25 = vperm.slane %v2090_v13, 3 }
  0xb8   :  { %v756_v45 = vadd.f32 %v755_v41, %v160_v42 }
  0xba   :  { %v729_v32 = vpop.f32.mrf.mxu2 }
  0xbb   :  { %v730_v34 = vadd.f32 %v729_v32, %v716_v29 }
  0xbd   :  { %v744_v36 = vadd.f32 %v743_v31, %v730_v34 }
  0xbf   :  { %v918_v39 = vmax.f32 %v744_v36, 0.0  ;;  %v757_v52 = vpop.f32.mrf.mxu3 }
  0xc0   :  { %v758_v56 = vadd.f32 %v757_v52, %v160_v42 }
  0xc1   :  { %v922_v40 = vpack.c.bf16 %v918_v39, %v914_v38 }
  0xc2   :  { %v797_v51 = vpop.f32.mrf.mxu2 }
  0xc3   :  { %1194 = vmatmul.bf16.vlgmr.msra.gmra.mxu3 %v922_v40 }
  0xca   :  { %v799_v3 = vpop.f32.mrf.mxu2 }
  0xcb   :  { %v769_v47 = vpop.f32.mrf.mxu0 }
  0xcc   :  { %v770_v49 = vadd.f32 %v769_v47, %v756_v45 }
  0xce   :  { %v783_v50 = vpop.f32.mrf.mxu1 }
  0xcf   :  { %v784_v55 = vadd.f32 %v783_v50, %v770_v49 }
  0xd1   :  { %v798_v61 = vadd.f32 %v797_v51, %v784_v55  ;;  %v1940_v51 = vld [vmem:[%s2109_s4] ss:$0 sm:$0xff] }
  0xd3   :  { %v771_v58 = vpop.f32.mrf.mxu0  ;;  %v915_v6 = vmax.f32 %v798_v61, 0.0 }
  0xd4   :  { %v772_v62 = vadd.f32 %v771_v58, %v758_v56 }
  0xd6   :  { %v785_v63 = vpop.f32.mrf.mxu1  ;;  %v825_v4 = vpop.f32.mrf.mxu2 }
  0xd7   :  { %v786_v2 = vadd.f32 %v785_v63, %v772_v62  ;;  %v811_v0 = vpop.f32.mrf.mxu3 }
  0xd8   :  { %v812_v16 = vadd.f32 %v811_v0, %v161_v12 }
  0xd9   :  { %v800_v7 = vadd.f32 %v799_v3, %v786_v2 }
  0xda   :  { %v826_v19 = vadd.f32 %v825_v4, %v812_v16 }
  0xdb   :  { %v919_v8 = vmax.f32 %v800_v7, 0.0 }
  0xdd   :  { %v923_v10 = vpack.c.bf16 %v919_v8, %v915_v6 }
  0xde   :  { %v853_v11 = vpop.f32.mrf.mxu1  ;;  %v827_v21 = vpop.f32.mrf.mxu2 }
  0xdf   :  { %1208 = vmatmul.bf16.vlgmr.msra.gmra.mxu0 %v923_v10  ;;  %v813_v17 = vpop.f32.mrf.mxu3 }
  0xe0   :  { %v814_v20 = vadd.f32 %v813_v17, %v161_v12 }
  0xe2   :  { %v828_v23 = vadd.f32 %v827_v21, %v814_v20 }
  0xe6   :  { %v855_v15 = vpop.f32.mrf.mxu1 }
  0xeb   :  { %v839_v18 = vpop.f32.mrf.mxu0 }
  0xec   :  { %v840_v22 = vadd.f32 %v839_v18, %v826_v19 }
  0xee   :  { %v854_v28 = vadd.f32 %v853_v11, %v840_v22 }
  0xf0   :  { %v916_v33 = vmax.f32 %v854_v28, 0.0 }
  0xf2   :  { %v881_v24 = vpop.f32.mrf.mxu1 }
  0xf3   :  { %v841_v27 = vpop.f32.mrf.mxu0 }
  0xf4   :  { %v842_v29 = vadd.f32 %v841_v27, %v828_v23 }
  0xf6   :  { %v856_v31 = vadd.f32 %v855_v15, %v842_v29  ;;  %v895_v32 = vpop.f32.mrf.mxu2 }
  0xf7   :  { %v867_v26 = vpop.f32.mrf.mxu3 }
  0xf8   :  { %v868_v30 = vadd.f32 %v867_v26, %v162_v25  ;;  %v920_v34 = vmax.f32 %v856_v31, 0.0 }
  0xfa   :  { %v924_v35 = vpack.c.bf16 %v920_v34, %v916_v33  ;;  %v882_v36 = vadd.f32 %v881_v24, %v868_v30  ;;  %v883_v40 = vpop.f32.mrf.mxu1 }
  0xfb   :  { %v909_v38 = vpop.f32.mrf.mxu0 }
  0xfc   :  { %1222 = vmatmul.bf16.vlgmr.msra.gmra.mxu1 %v924_v35  ;;  %v896_v41 = vadd.f32 %v895_v32, %v882_v36 }
  0xfe   :  { %v897_v43 = vpop.f32.mrf.mxu2  ;;  %v910_v13 = vadd.f32 %v909_v38, %v896_v41 }
  0xff   :  { %v869_v37 = vpop.f32.mrf.mxu3 }
 0x100   :  { %v870_v39 = vadd.f32 %v869_v37, %v162_v25  ;;  %v917_v47 = vmax.f32 %v910_v13, 0.0 }
 0x102   :  { %v884_v42 = vadd.f32 %v883_v40, %v870_v39 }
 0x103   :  { %v911_v45 = vpop.f32.mrf.mxu0 }
 0x104   :  { %v898_v44 = vadd.f32 %v897_v43, %v884_v42 }
 0x106   :  { %v912_v46 = vadd.f32 %v911_v45, %v898_v44 }
 0x108   :  { %v921_v48 = vmax.f32 %v912_v46, 0.0 }
 0x10a   :  { %v925_v49 = vpack.c.bf16 %v921_v48, %v917_v47 }
 0x10c   :  { %1236 = vmatmul.bf16.vlgmr.msra.gmra.mxu2 %v925_v49 }
 0x146   :  { %v1195_v50 = vpop.f32.mrf.mxu3 }
 0x147   :  { %v1196_v54 = vadd.f32 %v1940_v51, %v1195_v50 }
 0x14e   :  { %v1197_v57 = vpop.f32.mrf.mxu3 }
 0x14f   :  { %v1198_v62 = vadd.f32 %v1940_v51, %v1197_v57 }
 0x15c   :  { %v1209_v52 = vpop.f32.mrf.mxu0 }
 0x15d   :  { %v1210_v55 = vadd.f32 %v1209_v52, %v1196_v54 }
 0x164   :  { %v1211_v61 = vpop.f32.mrf.mxu0 }
 0x165   :  { %v1212_v1 = vadd.f32 %v1211_v61, %v1198_v62 }
 0x179   :  { %v1223_v53 = vpop.f32.mrf.mxu1 }
 0x17a   :  { %v1224_v56 = vadd.f32 %v1223_v53, %v1210_v55 }
 0x181   :  { %v1225_v63 = vpop.f32.mrf.mxu1 }
 0x182   :  { %v1226_v2 = vadd.f32 %v1225_v63, %v1212_v1 }
 0x18f   :  { %v1237_v58 = vpop.f32.mrf.mxu2 }
 0x190   :  { %v1238_v59 = vadd.f32 %v1237_v58, %v1224_v56 }
 0x192   :  { %1242 = vst [vmem:[%s2110_s5] sm:$0xff] %v1238_v59 }
 0x197   :  { %v1239_v3 = vpop.f32.mrf.mxu2 }
 0x198   :  { %v1240_v5 = vadd.f32 %v1239_v3, %v1226_v2 }
 0x19a   :  { %1243 = vst [vmem:[%s2110_s5 + $0x8] sm:$0xff] %v1240_v5 }
 0x19b   :  { %1248 = vsyncpa [#allocation3], 1 }
 0x19c   :  { %1249 = vsyncpa [#allocation5], 1 }

</bundles_post_ra>
